<compile_context>
chip_gen: v7x
topology: tpu7x:2x2x1
jax: 0.10.0
libtpu: 0.0.40
codegen_flags: <defaults>
</compile_context>

<pallas_src>
import math
import jax
import jax.numpy as jnp
from jax.experimental import pallas as pl
from jax.experimental.pallas import tpu as pltpu

# ----------------------------- configuration ------------------------------
BATCH = 6          # batch size (small test size)
SEQ = 8            # session length N
DIM = 32           # hiddenSize
NUM_NODE = 50      # vocabulary size
ALPHA = 0.2        # LeakyReLU negative slope (opt.alpha)


# ------------------------------ Pallas kernel ------------------------------
def _combine_graph_kernel(h_ref, adj_ref, a_ref, out_ref):
    """Block: h (Bt,N,D) f32, adj (Bt,N,N) i32, a (2,4,D) f32 -> out (Bt,N,D) f32."""
    h = h_ref[...]          # (Bt, N, D) float32
    adj = adj_ref[...]      # (Bt, N, N) int32
    n = adj.shape[-1]

    def local_agg(x, a_mat):
        # Fused 4-edge-type attention scores in ONE batched MXU matmul per
        # element:  x4 = concat_k(x * a_k) -> (Bt, 4N, D);  e = x4 @ x^T.
        # The concat is along the sublane dim with 8-row (native tile) pieces,
        # so it is layout-trivial (no lane-crossing reshape).
        x4 = jnp.concatenate(
            [x * a_mat[k][None, None, :] for k in range(4)], axis=1)   # (Bt,4N,D)
        e = jnp.einsum('bmd,bnd->bmn', x4, x,
                       preferred_element_type=jnp.float32)             # (Bt,4N,N)
        e = jnp.where(e > 0, e, ALPHA * e)                             # LeakyReLU once
        neg = jnp.full(adj.shape, -9e15, jnp.float32)
        att = jnp.where(adj == 1, e[:, 0 * n:1 * n, :], neg)
        att = jnp.where(adj == 2, e[:, 1 * n:2 * n, :], att)
        att = jnp.where(adj == 3, e[:, 2 * n:3 * n, :], att)
        att = jnp.where(adj == 4, e[:, 3 * n:4 * n, :], att)
        # softmax over last axis (masked rows -> uniform 1/N, matching PyTorch)
        att = att - jnp.max(att, axis=-1, keepdims=True)
        p = jnp.exp(att)
        # EUP approximate reciprocal: lives in its own VLIW slot (free-ish).
        p = p * pl.reciprocal(jnp.sum(p, axis=-1, keepdims=True), approx=True)
        return jnp.einsum('bmn,bnd->bmd', p, x,
                          preferred_element_type=jnp.float32)          # (Bt,N,D)

    a1 = a_ref[0]               # (4, D)
    a2 = a_ref[1]               # (4, D)
    h1 = local_agg(h, a1) + h   # local_agg_1 + residual
    h2 = local_agg(h1, a2) + h1 # local_agg_2 + residual
    out_ref[...] = h2.astype(out_ref.dtype)


def _pick_block_b(batch):
    """Batch elements per grid step.

    Amortizes the ~0.35 us/step grid overhead. VMEM budget: even Bt=32 is
    ~2x(32*8*32*4 + 32*8*8*4 + 32*8*32*4) < 200 KiB with double-buffering —
    far under the scoped default on v5e/v6e and v7x's 64 MiB physical VMEM.
    For small batches keep grid >= 2 so both v7x TensorCores get work.
    """
    if batch >= 32:
        return 16
    return max(1, batch // 2)


def combine_graph_local(h, adj, a_stack, *, block_b=None):
    """h: (B,N,D) f32, adj: (B,N,N) int, a_stack: (2,4,D) f32 -> (B,N,D) f32."""
    B, N, D = h.shape
    if block_b is None:
        block_b = _pick_block_b(B)
    num_blocks = pl.cdiv(B, block_b)
    Bp = num_blocks * block_b
    if Bp != B:
        # Zero padding is numerically safe: all-zero adj rows give a uniform
        # softmax over zero embeddings (no NaNs); padded rows sliced off below.
        h = jnp.pad(h, ((0, Bp - B), (0, 0), (0, 0)))
        adj = jnp.pad(adj, ((0, Bp - B), (0, 0), (0, 0)))

    out = pl.pallas_call(
        _combine_graph_kernel,
        out_shape=jax.ShapeDtypeStruct((Bp, N, D), jnp.float32),
        grid=(num_blocks,),
        in_specs=[
            pl.BlockSpec((block_b, N, D), lambda b: (b, 0, 0)),
            pl.BlockSpec((block_b, N, N), lambda b: (b, 0, 0)),
            # a1/a2 merged into one resident operand; constant index_map =>
            # fetched once, not re-DMA'd every grid step.
            pl.BlockSpec((2, 4, D), lambda b: (0, 0, 0)),
        ],
        out_specs=pl.BlockSpec((block_b, N, D), lambda b: (b, 0, 0)),
        compiler_params=pltpu.CompilerParams(
            dimension_semantics=("parallel",)),
    )(h, adj.astype(jnp.int32), a_stack)
    return out[:B] if Bp != B else out


# ------------------------- parameter construction --------------------------
def init_params(key):
    """Deterministic init matching reset_parameters(): U(-stdv, stdv), stdv=1/sqrt(dim)."""
    stdv = 1.0 / math.sqrt(DIM)
    k_emb, k_a = jax.random.split(key)
    embedding = jax.random.uniform(k_emb, (NUM_NODE, DIM), jnp.float32, -stdv, stdv)
    # a_stack[l] holds LocalAggregator_{l+1}'s a_0..a_3 rows (each originally (D,1)).
    a_stack = jax.random.uniform(k_a, (2, 4, DIM), jnp.float32, -stdv, stdv)
    return embedding, a_stack


def combine_graph_forward(params, inputs, adj, mask_item, item):
    """Mirrors CombineGraph.forward in eval mode; returns (h_local, con_loss)."""
    embedding, a_stack = params
    # TODO(synk): embedding gather kept as an XLA op (glue); fusing it via scalar
    # prefetch is only worthwhile at production batch sizes.
    h = embedding[inputs]                       # (B, N, D)
    h_local = combine_graph_local(h, adj.astype(jnp.int32), a_stack)
    con_loss = 0.0                              # eval path: no SSL loss, dropout = identity
    return h_local, con_loss


# ------------------------------ reference ----------------------------------
def _ref_local_agg(h, adj, a_mat):
    # pure-JAX reference of LocalAggregator
    e = jnp.einsum('bid,bjd,kd->bijk', h, h, a_mat)        # (B,N,N,4)
    e = jnp.where(e > 0, e, ALPHA * e)
    att = jnp.full(adj.shape, -9e15, jnp.float32)
    for k in range(4):
        att = jnp.where(adj == (k + 1), e[..., k], att)
    att = jax.nn.softmax(att, axis=-1)
    return jnp.einsum('bij,bjd->bid', att, h)


def _ref_forward(params, inputs, adj):
    embedding, a_stack = params
    h = embedding[inputs]
    h1 = _ref_local_agg(h, adj, a_stack[0]) + h
    h2 = _ref_local_agg(h1, adj, a_stack[1]) + h1
    return h2


# --------------------------------- main -------------------------------------
if __name__ == "__main__":
    key = jax.random.PRNGKey(0)
    k_par, k_in, k_adj, k_item = jax.random.split(key, 4)

    params = init_params(k_par)
    embedding, a_stack = params

    inputs = jax.random.randint(k_in, (BATCH, SEQ), 1, NUM_NODE, jnp.int32)
    adj = jax.random.randint(k_adj, (BATCH, SEQ, SEQ), 0, 5, jnp.int32)  # edge types 0..4
    mask_item = jnp.ones((BATCH, SEQ), jnp.int32)
    item = jax.random.randint(k_item, (BATCH, SEQ), 1, NUM_NODE, jnp.int32)

    ref = _ref_forward(params, inputs, adj)

    # 1) default block-size heuristic (block_b=3, grid=(2,))
    h_local, con_loss = combine_graph_forward(params, inputs, adj, mask_item, item)
    h_local = jax.block_until_ready(h_local)
    assert h_local.shape == (BATCH, SEQ, DIM)
    assert jnp.allclose(h_local, ref, atol=2e-3, rtol=2e-3), "mismatch (default block)"

    # 2) block size that does not divide the batch (exercises the padding path)
    h = embedding[inputs]
    h_pad = combine_graph_local(h, adj, a_stack, block_b=4)
    h_pad = jax.block_until_ready(h_pad)
    assert h_pad.shape == (BATCH, SEQ, DIM)
    assert jnp.allclose(h_pad, ref, atol=2e-3, rtol=2e-3), "mismatch (padded block)"

    print("KERNEL_OK")
</pallas_src>

<mosaic_0001>
module attributes {stable_mosaic.version = 11 : i64} {
  func.func @_combine_graph_kernel(%arg0: i32, %arg1: memref<3x8x32xf32, #tpu.memory_space<vmem>>, %arg2: memref<3x8x8xi32, #tpu.memory_space<vmem>>, %arg3: memref<2x4x32xf32, #tpu.memory_space<vmem>>, %arg4: memref<3x8x32xf32, #tpu.memory_space<vmem>>) attributes {dimension_semantics = [#tpu.dimension_semantics<parallel>], iteration_bounds = array<i64: 2>, scalar_prefetch = 0 : i64, scratch_operands = 0 : i64, tpu.core_type = #tpu.core_type<tc>, window_params = [{transform_indices = @transform_0, window_bounds = array<i64: 3, 8, 32>}, {transform_indices = @transform_1, window_bounds = array<i64: 3, 8, 8>}, {pipeline_mode = #tpu.pipeline_mode<synchronous>, transform_indices = @transform_2, window_bounds = array<i64: 2, 4, 32>}, {transform_indices = @transform_3, window_bounds = array<i64: 3, 8, 32>}]} {
    %c0 = arith.constant 0 : index
    %c0_0 = arith.constant 0 : index
    %c0_1 = arith.constant 0 : index
    %0 = vector.load %arg1[%c0, %c0_0, %c0_1] : memref<3x8x32xf32, #tpu.memory_space<vmem>>, vector<3x8x32xf32>
    %c0_2 = arith.constant 0 : index
    %c0_3 = arith.constant 0 : index
    %c0_4 = arith.constant 0 : index
    %1 = vector.load %arg2[%c0_2, %c0_3, %c0_4] : memref<3x8x8xi32, #tpu.memory_space<vmem>>, vector<3x8x8xi32>
    %c0_5 = arith.constant 0 : index
    %c0_6 = arith.constant 0 : index
    %c0_7 = arith.constant 0 : index
    %2 = vector.load %arg3[%c0_5, %c0_6, %c0_7] : memref<2x4x32xf32, #tpu.memory_space<vmem>>, vector<1x4x32xf32>
    %3 = vector.shape_cast %2 : vector<1x4x32xf32> to vector<4x32xf32>
    %c1 = arith.constant 1 : index
    %c0_8 = arith.constant 0 : index
    %c0_9 = arith.constant 0 : index
    %4 = vector.load %arg3[%c1, %c0_8, %c0_9] : memref<2x4x32xf32, #tpu.memory_space<vmem>>, vector<1x4x32xf32>
    %5 = vector.shape_cast %4 : vector<1x4x32xf32> to vector<4x32xf32>
    %6 = vector.extract_strided_slice %3 {offsets = [0, 0], sizes = [1, 32], strides = [1, 1]} : vector<4x32xf32> to vector<1x32xf32>
    %7 = vector.shape_cast %6 : vector<1x32xf32> to vector<32xf32>
    %8 = vector.shape_cast %7 : vector<32xf32> to vector<1x1x32xf32>
    %9 = vector.broadcast %8 : vector<1x1x32xf32> to vector<3x8x32xf32>
    %10 = arith.mulf %0, %9 : vector<3x8x32xf32>
    %11 = vector.extract_strided_slice %3 {offsets = [1, 0], sizes = [1, 32], strides = [1, 1]} : vector<4x32xf32> to vector<1x32xf32>
    %12 = vector.shape_cast %11 : vector<1x32xf32> to vector<32xf32>
    %13 = vector.shape_cast %12 : vector<32xf32> to vector<1x1x32xf32>
    %14 = vector.broadcast %13 : vector<1x1x32xf32> to vector<3x8x32xf32>
    %15 = arith.mulf %0, %14 : vector<3x8x32xf32>
    %16 = vector.extract_strided_slice %3 {offsets = [2, 0], sizes = [1, 32], strides = [1, 1]} : vector<4x32xf32> to vector<1x32xf32>
    %17 = vector.shape_cast %16 : vector<1x32xf32> to vector<32xf32>
    %18 = vector.shape_cast %17 : vector<32xf32> to vector<1x1x32xf32>
    %19 = vector.broadcast %18 : vector<1x1x32xf32> to vector<3x8x32xf32>
    %20 = arith.mulf %0, %19 : vector<3x8x32xf32>
    %21 = vector.extract_strided_slice %3 {offsets = [3, 0], sizes = [1, 32], strides = [1, 1]} : vector<4x32xf32> to vector<1x32xf32>
    %22 = vector.shape_cast %21 : vector<1x32xf32> to vector<32xf32>
    %23 = vector.shape_cast %22 : vector<32xf32> to vector<1x1x32xf32>
    %24 = vector.broadcast %23 : vector<1x1x32xf32> to vector<3x8x32xf32>
    %25 = arith.mulf %0, %24 : vector<3x8x32xf32>
    %26 = tpu.concatenate %10, %15, %20, %25 in 1 : vector<3x8x32xf32>, vector<3x8x32xf32>, vector<3x8x32xf32>, vector<3x8x32xf32> -> vector<3x32x32xf32>
    "tpu.trace_start"() <{level = 10 : i32, message = "bmd,bnd->bmn"}> : () -> ()
    %cst = arith.constant dense<0.000000e+00> : vector<3x32x8xf32>
    %27 = tpu.matmul %26, %0, %cst {dimension_numbers = #tpu.dot_dimension_numbers<[2], [2], [1], [1], [0, 0, 0, 1, 1, 1], [0], [0]>} : vector<3x32x32xf32>, vector<3x8x32xf32>, vector<3x32x8xf32> -> vector<3x32x8xf32>
    %cst_10 = arith.constant 0.000000e+00 : f32
    "tpu.trace_stop"() : () -> ()
    %28 = vector.broadcast %cst_10 : f32 to vector<3x32x8xf32>
    %29 = arith.cmpf ogt, %27, %28 : vector<3x32x8xf32>
    %cst_11 = arith.constant 2.000000e-01 : f32
    %30 = vector.broadcast %cst_11 : f32 to vector<3x32x8xf32>
    %31 = arith.mulf %30, %27 : vector<3x32x8xf32>
    %32 = arith.select %29, %27, %31 : vector<3x32x8xi1>, vector<3x32x8xf32>
    %cst_12 = arith.constant -9.000000e+15 : f32
    %33 = vector.broadcast %cst_12 : f32 to vector<3x8x8xf32>
    %c1_i32 = arith.constant 1 : i32
    %34 = vector.broadcast %c1_i32 : i32 to vector<3x8x8xi32>
    %35 = arith.cmpi eq, %1, %34 : vector<3x8x8xi32>
    %36 = vector.extract_strided_slice %32 {offsets = [0, 0, 0], sizes = [3, 8, 8], strides = [1, 1, 1]} : vector<3x32x8xf32> to vector<3x8x8xf32>
    %37 = arith.select %35, %36, %33 : vector<3x8x8xi1>, vector<3x8x8xf32>
    %c2_i32 = arith.constant 2 : i32
    %38 = vector.broadcast %c2_i32 : i32 to vector<3x8x8xi32>
    %39 = arith.cmpi eq, %1, %38 : vector<3x8x8xi32>
    %40 = vector.extract_strided_slice %32 {offsets = [0, 8, 0], sizes = [3, 8, 8], strides = [1, 1, 1]} : vector<3x32x8xf32> to vector<3x8x8xf32>
    %41 = arith.select %39, %40, %37 : vector<3x8x8xi1>, vector<3x8x8xf32>
    %c3_i32 = arith.constant 3 : i32
    %42 = vector.broadcast %c3_i32 : i32 to vector<3x8x8xi32>
    %43 = arith.cmpi eq, %1, %42 : vector<3x8x8xi32>
    %44 = vector.extract_strided_slice %32 {offsets = [0, 16, 0], sizes = [3, 8, 8], strides = [1, 1, 1]} : vector<3x32x8xf32> to vector<3x8x8xf32>
    %45 = arith.select %43, %44, %41 : vector<3x8x8xi1>, vector<3x8x8xf32>
    %c4_i32 = arith.constant 4 : i32
    %46 = vector.broadcast %c4_i32 : i32 to vector<3x8x8xi32>
    %47 = arith.cmpi eq, %1, %46 : vector<3x8x8xi32>
    %48 = vector.extract_strided_slice %32 {offsets = [0, 24, 0], sizes = [3, 8, 8], strides = [1, 1, 1]} : vector<3x32x8xf32> to vector<3x8x8xf32>
    %49 = arith.select %47, %48, %45 : vector<3x8x8xi1>, vector<3x8x8xf32>
    %cst_13 = arith.constant dense<0xFF800000> : vector<3x8xf32>
    %50 = vector.multi_reduction <maximumf>, %49, %cst_13 [2] : vector<3x8x8xf32> to vector<3x8xf32>
    %51 = vector.shape_cast %50 : vector<3x8xf32> to vector<3x8x1xf32>
    %52 = vector.broadcast %51 : vector<3x8x1xf32> to vector<3x8x8xf32>
    %53 = arith.subf %49, %52 : vector<3x8x8xf32>
    %54 = math.exp %53 : vector<3x8x8xf32>
    %cst_14 = arith.constant dense<0.000000e+00> : vector<3x8xf32>
    %55 = vector.multi_reduction <add>, %54, %cst_14 [2] : vector<3x8x8xf32> to vector<3x8xf32>
    %56 = vector.shape_cast %55 : vector<3x8xf32> to vector<3x8x1xf32>
    %57 = tpu.reciprocal %56 {approx = true} : vector<3x8x1xf32> -> vector<3x8x1xf32>
    %58 = vector.broadcast %57 : vector<3x8x1xf32> to vector<3x8x8xf32>
    %59 = arith.mulf %54, %58 : vector<3x8x8xf32>
    "tpu.trace_start"() <{level = 10 : i32, message = "bmn,bnd->bmd"}> : () -> ()
    %cst_15 = arith.constant dense<0.000000e+00> : vector<3x8x32xf32>
    %60 = tpu.matmul %59, %0, %cst_15 {dimension_numbers = #tpu.dot_dimension_numbers<[2], [1], [1], [2], [0, 0, 0, 1, 1, 2], [0], [0]>} : vector<3x8x8xf32>, vector<3x8x32xf32>, vector<3x8x32xf32> -> vector<3x8x32xf32>
    "tpu.trace_stop"() : () -> ()
    %61 = arith.addf %60, %0 : vector<3x8x32xf32>
    %62 = vector.extract_strided_slice %5 {offsets = [0, 0], sizes = [1, 32], strides = [1, 1]} : vector<4x32xf32> to vector<1x32xf32>
    %63 = vector.shape_cast %62 : vector<1x32xf32> to vector<32xf32>
    %64 = vector.shape_cast %63 : vector<32xf32> to vector<1x1x32xf32>
    %65 = vector.broadcast %64 : vector<1x1x32xf32> to vector<3x8x32xf32>
    %66 = arith.mulf %61, %65 : vector<3x8x32xf32>
    %67 = vector.extract_strided_slice %5 {offsets = [1, 0], sizes = [1, 32], strides = [1, 1]} : vector<4x32xf32> to vector<1x32xf32>
    %68 = vector.shape_cast %67 : vector<1x32xf32> to vector<32xf32>
    %69 = vector.shape_cast %68 : vector<32xf32> to vector<1x1x32xf32>
    %70 = vector.broadcast %69 : vector<1x1x32xf32> to vector<3x8x32xf32>
    %71 = arith.mulf %61, %70 : vector<3x8x32xf32>
    %72 = vector.extract_strided_slice %5 {offsets = [2, 0], sizes = [1, 32], strides = [1, 1]} : vector<4x32xf32> to vector<1x32xf32>
    %73 = vector.shape_cast %72 : vector<1x32xf32> to vector<32xf32>
    %74 = vector.shape_cast %73 : vector<32xf32> to vector<1x1x32xf32>
    %75 = vector.broadcast %74 : vector<1x1x32xf32> to vector<3x8x32xf32>
    %76 = arith.mulf %61, %75 : vector<3x8x32xf32>
    %77 = vector.extract_strided_slice %5 {offsets = [3, 0], sizes = [1, 32], strides = [1, 1]} : vector<4x32xf32> to vector<1x32xf32>
    %78 = vector.shape_cast %77 : vector<1x32xf32> to vector<32xf32>
    %79 = vector.shape_cast %78 : vector<32xf32> to vector<1x1x32xf32>
    %80 = vector.broadcast %79 : vector<1x1x32xf32> to vector<3x8x32xf32>
    %81 = arith.mulf %61, %80 : vector<3x8x32xf32>
    %82 = tpu.concatenate %66, %71, %76, %81 in 1 : vector<3x8x32xf32>, vector<3x8x32xf32>, vector<3x8x32xf32>, vector<3x8x32xf32> -> vector<3x32x32xf32>
    "tpu.trace_start"() <{level = 10 : i32, message = "bmd,bnd->bmn"}> : () -> ()
    %cst_16 = arith.constant dense<0.000000e+00> : vector<3x32x8xf32>
    %83 = tpu.matmul %82, %61, %cst_16 {dimension_numbers = #tpu.dot_dimension_numbers<[2], [2], [1], [1], [0, 0, 0, 1, 1, 1], [0], [0]>} : vector<3x32x32xf32>, vector<3x8x32xf32>, vector<3x32x8xf32> -> vector<3x32x8xf32>
    %cst_17 = arith.constant 0.000000e+00 : f32
    "tpu.trace_stop"() : () -> ()
    %84 = vector.broadcast %cst_17 : f32 to vector<3x32x8xf32>
    %85 = arith.cmpf ogt, %83, %84 : vector<3x32x8xf32>
    %cst_18 = arith.constant 2.000000e-01 : f32
    %86 = vector.broadcast %cst_18 : f32 to vector<3x32x8xf32>
    %87 = arith.mulf %86, %83 : vector<3x32x8xf32>
    %88 = arith.select %85, %83, %87 : vector<3x32x8xi1>, vector<3x32x8xf32>
    %cst_19 = arith.constant -9.000000e+15 : f32
    %89 = vector.broadcast %cst_19 : f32 to vector<3x8x8xf32>
    %c1_i32_20 = arith.constant 1 : i32
    %90 = vector.broadcast %c1_i32_20 : i32 to vector<3x8x8xi32>
    %91 = arith.cmpi eq, %1, %90 : vector<3x8x8xi32>
    %92 = vector.extract_strided_slice %88 {offsets = [0, 0, 0], sizes = [3, 8, 8], strides = [1, 1, 1]} : vector<3x32x8xf32> to vector<3x8x8xf32>
    %93 = arith.select %91, %92, %89 : vector<3x8x8xi1>, vector<3x8x8xf32>
    %c2_i32_21 = arith.constant 2 : i32
    %94 = vector.broadcast %c2_i32_21 : i32 to vector<3x8x8xi32>
    %95 = arith.cmpi eq, %1, %94 : vector<3x8x8xi32>
    %96 = vector.extract_strided_slice %88 {offsets = [0, 8, 0], sizes = [3, 8, 8], strides = [1, 1, 1]} : vector<3x32x8xf32> to vector<3x8x8xf32>
    %97 = arith.select %95, %96, %93 : vector<3x8x8xi1>, vector<3x8x8xf32>
    %c3_i32_22 = arith.constant 3 : i32
    %98 = vector.broadcast %c3_i32_22 : i32 to vector<3x8x8xi32>
    %99 = arith.cmpi eq, %1, %98 : vector<3x8x8xi32>
    %100 = vector.extract_strided_slice %88 {offsets = [0, 16, 0], sizes = [3, 8, 8], strides = [1, 1, 1]} : vector<3x32x8xf32> to vector<3x8x8xf32>
    %101 = arith.select %99, %100, %97 : vector<3x8x8xi1>, vector<3x8x8xf32>
    %c4_i32_23 = arith.constant 4 : i32
    %102 = vector.broadcast %c4_i32_23 : i32 to vector<3x8x8xi32>
    %103 = arith.cmpi eq, %1, %102 : vector<3x8x8xi32>
    %104 = vector.extract_strided_slice %88 {offsets = [0, 24, 0], sizes = [3, 8, 8], strides = [1, 1, 1]} : vector<3x32x8xf32> to vector<3x8x8xf32>
    %105 = arith.select %103, %104, %101 : vector<3x8x8xi1>, vector<3x8x8xf32>
    %cst_24 = arith.constant dense<0xFF800000> : vector<3x8xf32>
    %106 = vector.multi_reduction <maximumf>, %105, %cst_24 [2] : vector<3x8x8xf32> to vector<3x8xf32>
    %107 = vector.shape_cast %106 : vector<3x8xf32> to vector<3x8x1xf32>
    %108 = vector.broadcast %107 : vector<3x8x1xf32> to vector<3x8x8xf32>
    %109 = arith.subf %105, %108 : vector<3x8x8xf32>
    %110 = math.exp %109 : vector<3x8x8xf32>
    %cst_25 = arith.constant dense<0.000000e+00> : vector<3x8xf32>
    %111 = vector.multi_reduction <add>, %110, %cst_25 [2] : vector<3x8x8xf32> to vector<3x8xf32>
    %112 = vector.shape_cast %111 : vector<3x8xf32> to vector<3x8x1xf32>
    %113 = tpu.reciprocal %112 {approx = true} : vector<3x8x1xf32> -> vector<3x8x1xf32>
    %114 = vector.broadcast %113 : vector<3x8x1xf32> to vector<3x8x8xf32>
    %115 = arith.mulf %110, %114 : vector<3x8x8xf32>
    "tpu.trace_start"() <{level = 10 : i32, message = "bmn,bnd->bmd"}> : () -> ()
    %cst_26 = arith.constant dense<0.000000e+00> : vector<3x8x32xf32>
    %116 = tpu.matmul %115, %61, %cst_26 {dimension_numbers = #tpu.dot_dimension_numbers<[2], [1], [1], [2], [0, 0, 0, 1, 1, 2], [0], [0]>} : vector<3x8x8xf32>, vector<3x8x32xf32>, vector<3x8x32xf32> -> vector<3x8x32xf32>
    "tpu.trace_stop"() : () -> ()
    %117 = arith.addf %116, %61 : vector<3x8x32xf32>
    %c0_27 = arith.constant 0 : index
    %c0_28 = arith.constant 0 : index
    %c0_29 = arith.constant 0 : index
    %118 = vector.load %arg4[%c0_27, %c0_28, %c0_29] : memref<3x8x32xf32, #tpu.memory_space<vmem>>, vector<3x8x32xf32>
    tpu.vector_store %arg4[%c0_27, %c0_28, %c0_29], %117 {strides = array<i32>} : memref<3x8x32xf32, #tpu.memory_space<vmem>>, vector<3x8x32xf32>,
    return
  }
  func.func @transform_0(%arg0: i32) -> (i32, i32, i32) {
    %c0_i32 = arith.constant 0 : i32
    %c0_i32_0 = arith.constant 0 : i32
    %c0_i32_1 = arith.constant 0 : i32
    return %arg0, %c0_i32, %c0_i32_0 : i32, i32, i32
  }
  func.func @transform_1(%arg0: i32) -> (i32, i32, i32) {
    %c0_i32 = arith.constant 0 : i32
    %c0_i32_0 = arith.constant 0 : i32
    %c0_i32_1 = arith.constant 0 : i32
    return %arg0, %c0_i32, %c0_i32_0 : i32, i32, i32
  }
  func.func @transform_2(%arg0: i32) -> (i32, i32, i32) {
    %c0_i32 = arith.constant 0 : i32
    %c0_i32_0 = arith.constant 0 : i32
    %c0_i32_1 = arith.constant 0 : i32
    %c0_i32_2 = arith.constant 0 : i32
    return %c0_i32, %c0_i32_0, %c0_i32_1 : i32, i32, i32
  }
  func.func @transform_3(%arg0: i32) -> (i32, i32, i32) {
    %c0_i32 = arith.constant 0 : i32
    %c0_i32_0 = arith.constant 0 : i32
    %c0_i32_1 = arith.constant 0 : i32
    return %arg0, %c0_i32, %c0_i32_0 : i32, i32, i32
  }
}

</mosaic_0001>

<bundles_post_ra>
// kernel: tpu_custom_call.1
= control target key start
LH: loop header
LB: loop body
LE: loop exit
PB: predicated region body
PF: predicated region fallthrough
CT: control target
= control target key end

     0   :  { %8 = vsyncpa [#allocation3], 0  ;;  %s2599_s0 = inlined_call_operand.hbm [shape: f32[6,8,32], index: 0, kind: input, shape index: {}]   ;;  %s2600_s1 = inlined_call_operand.hbm [shape: s32[6,8,8], index: 1, kind: input, shape index: {}]   ;;  %s2601_s2 = inlined_call_operand.hbm [shape: f32[2,4,32], index: 2, kind: input, shape index: {}]   ;;  %s2602_s3 = inlined_call_operand.hbm [shape: f32[6,8,32], index: 3, kind: output, shape index: {}]  }
   0x1   :  { %10 = vsyncpa [#allocation3 + $0x1], 0 }
   0x2   :  { %11 = vsyncpa [#allocation6], 0 }
   0x3   :  { %13 = vsyncpa [#allocation6 + $0x1], 0 }
   0x4   :  { %14 = vsyncpa [#allocation4], 0 }
   0x5   :  { %16 = vsyncpa [#allocation4 + $0x1], 0  ;;  %s2110_s12 = smov 0   ;;  %s2112_s13 = smov 0  }
   0x6   :  { %s2114_s14 = smov 0   ;;  %s2116_s15 = smov 0  }
   0x7 LB: > { %s2131_s16 = sadd.s32 4294967295, %s2076_s15   ;;  %s1647_s17 = sadd.s32 4294967294, %s2076_s15   ;;  %s2076_s15 = sphi %s2116_s15, %s2650_s15   ;;  %s2072_s14 = sphi %s2114_s14, %s2649_s14   ;;  %s2068_s13 = sphi %s2112_s13, %s2648_s13   ;;  %s2064_s12 = sphi %s2110_s12, %s2647_s12  }
   0x8   : > { %p42_p0 = scmp.ne.s32.totalorder %s2068_s13, %s2064_s12  ;;  %p2603_p1 = scmp.eq.s32.totalorder %s2131_s16, 0 }
   0x9   : > { %p119_p3 = scmp.eq.s32.totalorder %s1647_s17, 1  ;;  %p1648_p5 = scmp.ge.s32.totalorder %s2076_s15, 1 }
   0xa   : > { %p2140_p4 = por %p2603_p1, %p42_p0  ;;  %p126_p7 = scmp.lt.s32.totalorder %s2076_s15, 3 }
   0xb   : > { %p2145_p6 = por %p119_p3, %p42_p0  ;;  %s2078_s21 = smov [#allocation7]  }
   0xc   : > { %s2611_s18 = scalar_select %p2140_p4, 1, 0 }
   0xd   : > { %s2612_s19 = scalar_select %p2145_p6, 1, 0 }
   0xe   : > { %p2150_p8 = pnand %p1648_p5, %p126_p7  ;;  %s138_s22 = sshll.u32 %s2078_s21, 4  ;;  %s2154_s22 = int_to_ptr.vmem [resolvable:$true] %s138_s22 }
   0xf   : > { %s2166_s24 = sadd.s32 1, %s2076_s15   ;;  %s29_s25 = sadd.s32 1, %s2072_s14 }
  0x10   : > { %s2613_s20 = scalar_select %p2150_p8, 1, 0 }
  0x11   : > { %p1830_p9 = pneg %p2150_p8  ;;  %s26_s26 = ssub.s32 %s2076_s15, %s2166_s24 }
  0x12   : > { %s1914_s29 = scalar_lea.hbm %s2601_s2, 128 }
  0x13   : > { %p2161_p11 = pnand %p1830_p9, %p2603_p1  ;;  %p1915_p12 = scmp.ne.s32.totalorder %s2601_s2, %s1914_s29 }
  0x14   : > { %p1921_p5 = scmp.lt.u32.totalorder %s1914_s29, %s2601_s2 }
  0x15   : > { %p1916_p13 = pneg %p2161_p11 }
  0x17   : > { %p1917_p0 = pnand %p1916_p13, %p1915_p12 }
  0x19   : > { %p1918_p3 = pneg %p1917_p0 }
  0x1b   : > { %p1923_p7 = pnand %p1921_p5, %p1918_p3 }
  0x1d   : > { %1926 = shalt.err (!%p1923_p7)
}
  0x1e   : > { %s1927_s7 = scalar_lea.vmem %s2154_s22, 128  ;;  %p1935_p2 = scmp.lt.s32.totalorder %s2154_s22, %s2154_s22 }
  0x1f   : > { %p1928_p9 = scmp.ne.s32.totalorder %s2154_s22, %s1927_s7  ;;  %p1936_p6 = scmp.lt.s32.totalorder %s1927_s7, %s1927_s7 }
  0x21   : > { %p1930_p10 = pnand %p1928_p9, %p1916_p13  ;;  %p1937_p4 = por %p1936_p6, %p1935_p2 }
  0x23   : > { %p1931_p1 = pneg %p1930_p10 }
  0x25   : > { %p1938_p8 = pnand %p1937_p4, %p1931_p1 }
  0x27   : > { %1941 = shalt.err (!%p1938_p8)
}
  0x28   : > { %s2079_s8 = smov 64   ;;  %s2080_s9 = smov 4  }
  0x29   : > { %1833 = dma.hbm_to_vmem [thread:$0]  (!%p2161_p11), %s2601_s2, 128, %s2154_s22, [#allocation6], %s2079_s8, %s2079_s8, %s2080_s9  }
  0x2a   : > { %p27_p1 = scmp.eq.s32.totalorder %s26_s26, 0  ;;  %p36_p2 = scmp.ne.s32.totalorder %s2072_s14, %s2068_s13 }
  0x2b   : > { %p37_p4 = scmp.eq.s32.totalorder %s2076_s15, 0  ;;  %p1846_p6 = scmp.lt.s32.totalorder %s2076_s15, 2 }
  0x2c   : > { %s2197_s17 = scalar_select %p27_p1, %s2072_s14, %s29_s25  }
  0x2d   : > { %p38_p8 = por %p37_p4, %p36_p2  ;;  %p2615_p10 = scmp.eq.s32.totalorder %s2131_s16, 1 }
  0x2e   : > { %s152_s27 = sand.u32 1, %s2072_s14   ;;  %s1694_s28 = smul.u32 384, %s2076_s15 }
  0x2f   : > { %p2201_p12 = por %p2615_p10, %p36_p2  ;;  %s2207_s29 = smul.u32 24, %s152_s27 }
  0x30   : > { %s2214_s22 = scalar_lea.hbm %s2599_s0, %s1694_s28  ;;  %p2216_p11 = pnand %p1846_p6, %p38_p8 }
  0x31   : > { %s156_s26 = scalar_lea.vmem [#allocation2], %s2207_s29  ;;  %s2223_s5 = scalar_lea.sflag [#allocation3], %s152_s27 }
  0x32   : > { %s163_s4 = sshll.u32 %s156_s26, 4  ;;  %s1942_s6 = scalar_lea.hbm %s2214_s22, 384  ;;  %s2221_s4 = int_to_ptr.vmem [resolvable:$true] %s163_s4 }
  0x33   : > { %p1943_p13 = scmp.ne.s32.totalorder %s2214_s22, %s1942_s6  ;;  %p1944_p0 = pneg %p2216_p11 }
  0x34   : > { %s1947_s9 = scalar_lea.hbm %s2599_s0, 768  ;;  %p1948_p7 = scmp.lt.u32.totalorder %s2214_s22, %s2599_s0 }
  0x35   : > { %p1945_p3 = pnand %p1944_p0, %p1943_p13  ;;  %p1949_p9 = scmp.lt.u32.totalorder %s1947_s9, %s1942_s6 }
  0x36   : > { %p1951_p2 = scmp.lt.u32.totalorder %s1942_s6, %s2214_s22 }
  0x37   : > { %p1946_p5 = pneg %p1945_p3  ;;  %p1950_p1 = por %p1949_p9, %p1948_p7 }
  0x39   : > { %p1952_p4 = por %p1951_p2, %p1950_p1 }
  0x3b   : > { %p1953_p6 = pnand %p1952_p4, %p1946_p5 }
  0x3d   : > { %1956 = shalt.err (!%p1953_p6)
}
  0x3e   : > { %s1957_s27 = scalar_lea.vmem %s2221_s4, 384  ;;  %s2081_s23 = smov [#allocation2]  }
  0x3f   : > { %p1958_p8 = scmp.ne.s32.totalorder %s2221_s4, %s1957_s27  ;;  %s1962_s30 = sshll.u32 %s2081_s23, 4  ;;  %s1963_s30 = int_to_ptr.vmem [resolvable:$false] %s1962_s30 }
  0x40   : > { %s1964_s26 = scalar_lea.vmem %s1963_s30, 768  ;;  %p1965_p3 = scmp.lt.s32.totalorder %s2221_s4, %s1963_s30 }
  0x41   : > { %p1960_p10 = pnand %p1958_p8, %p1944_p0  ;;  %p1966_p7 = scmp.lt.s32.totalorder %s1964_s26, %s1957_s27 }
  0x43   : > { %p1961_p13 = pneg %p1960_p10  ;;  %p1967_p9 = por %p1966_p7, %p1965_p3 }
  0x45   : > { %p1968_p1 = pnand %p1967_p9, %p1961_p13 }
  0x47   : > { %1971 = shalt.err (!%p1968_p1)
}
  0x48   : > { %s2082_s6 = smov 128   ;;  %s2083_s7 = smov 8  }
  0x49   : > { %1837 = dma.hbm_to_vmem [thread:$0]  (!%p2216_p11), %s2214_s22, 384, %s2221_s4, %s2223_s5, %s2082_s6, %s2082_s6, %s2083_s7  }
  0x4a   : > { %s173_s8 = sand.u32 1, %s2076_s15   ;;  %s2260_s11 = scalar_lea.hbm %s2600_s1, %s1694_s28 }
  0x4b   : > { %s177_s27 = scalar_lea.vmem [#allocation5], %s2207_s29  ;;  %s2265_s30 = scalar_lea.sflag [#allocation6], %s173_s8 }
  0x4c   : > { %s184_s23 = sshll.u32 %s177_s27, 4  ;;  %s1972_s26 = scalar_lea.hbm %s2260_s11, 384  ;;  %s2263_s23 = int_to_ptr.vmem [resolvable:$true] %s184_s23 }
  0x4d   : > { %p1973_p5 = scmp.ne.s32.totalorder %s2260_s11, %s1972_s26  ;;  %s1977_s28 = scalar_lea.hbm %s2600_s1, 768 }
  0x4e   : > { %p1978_p6 = scmp.lt.u32.totalorder %s2260_s11, %s2600_s1  ;;  %p1979_p8 = scmp.lt.u32.totalorder %s1977_s28, %s1972_s26 }
  0x4f   : > { %p1975_p2 = pnand %p1973_p5, %p1944_p0  ;;  %p1981_p13 = scmp.lt.u32.totalorder %s1972_s26, %s2260_s11 }
  0x50   : > { %p1980_p10 = por %p1979_p8, %p1978_p6 }
  0x51   : > { %p1976_p4 = pneg %p1975_p2 }
  0x52   : > { %p1982_p3 = por %p1981_p13, %p1980_p10 }
  0x54   : > { %p1983_p7 = pnand %p1982_p3, %p1976_p4 }
  0x56   : > { %1986 = shalt.err (!%p1983_p7)
}
  0x57   : > { %s1987_s29 = scalar_lea.vmem %s2263_s23, 384  ;;  %s2084_s8 = smov [#allocation5]  }
  0x58   : > { %p1988_p9 = scmp.ne.s32.totalorder %s2263_s23, %s1987_s29  ;;  %s1992_s10 = sshll.u32 %s2084_s8, 4  ;;  %s1993_s10 = int_to_ptr.vmem [resolvable:$false] %s1992_s10 }
  0x59   : > { %s1994_s27 = scalar_lea.vmem %s1993_s10, 768  ;;  %p1995_p2 = scmp.lt.s32.totalorder %s2263_s23, %s1993_s10 }
  0x5a   : > { %p1990_p1 = pnand %p1988_p9, %p1944_p0  ;;  %p1996_p6 = scmp.lt.s32.totalorder %s1994_s27, %s1987_s29 }
  0x5c   : > { %p1991_p5 = pneg %p1990_p1  ;;  %p1997_p8 = por %p1996_p6, %p1995_p2 }
  0x5e   : > { %p1998_p10 = pnand %p1997_p8, %p1991_p5 }
  0x60   : > { %2001 = shalt.err (!%p1998_p10)
}
  0x61   : > { %1840 = dma.hbm_to_vmem [thread:$0]  (!%p2216_p11), %s2260_s11, 384, %s2263_s23, %s2265_s30, %s2082_s6, %s2082_s6, %s2083_s7  }
  0x62   : > { %p2618_p0 = scmp.ne.s32.totalorder %s2613_s20, 0 }
  0x63   : > { %s2297_s26 = sand.u32 (!%p2618_p0), 1, %s2068_s13   ;;  %p2619_p4 = scmp.ne.s32.totalorder (!%p2618_p0), %s2611_s18, 0 }
  0x64   : > { %196 = sbr.rel (%p2618_p0) target bundleno = 1653 (0x675), region = 32  ;;  %s199_s25 = scalar_lea.sflag (!%p2618_p0), [#allocation3], %s2297_s26 }
  0x65   : > { %s2300_s22 = smul.u32 (!%p2618_p0), 24, %s2297_s26 }
  0x67   : > { %s202_s4 = scalar_lea.vmem (!%p2618_p0), [#allocation2], %s2300_s22 }
  0x6b   : > { %2047 = dma.done.wait (%p2619_p4), %s199_s25, 384  }
  0x6c   : > { %2049 = vsyncadd (%p2619_p4), %s199_s25, 4294966912  ;;  %s207_s20 = sand.u32 1, %s2131_s16   ;;  %s2310_s7 = scalar_lea.vmem [#allocation5], %s2300_s22 }
  0x6d   : > { %s208_s6 = scalar_lea.sflag [#allocation6], %s207_s20 }
  0x6e   : > { %2051 = dma.done.wait (%p2619_p4), %s208_s6, 384  }
  0x6f   : > { %2053 = vsyncadd (%p2619_p4), %s208_s6, 4294966912  ;;  %p2620_p11 = scmp.eq.s32.totalorder %s2131_s16, 0 }
  0x71   : > { %2055 = dma.done.wait (%p2620_p11), [#allocation6], 128   ;;  %p2621_p13 = pmov %p2620_p11 }
  0x72   : > { %v255_v0 = vlaneseq  ;;  %vm2606_vm0 = vcmask 261120   ;;  %v2326_v6 = vld [vmem:[%s202_s4] sm:$0xff]  ;;  %v2334_v10 = vld [vmem:[%s202_s4 + $0x8] sm:$0xff]  ;;  %v2336_v11 = vld [vmem:[%s202_s4 + $0x10] sm:$0xff]  ;;  %vm644_vm10 = vcmask 64512   ;;  %s242_s18 = scalar_lea.vmem [#allocation8], %s2300_s22 }
  0x73   : > { %2057 = vsyncadd (%p2621_p13), [#allocation6], 4294967168  ;;  %v252_v7 = vld [vmem:[#allocation7] sm:$0xf]  ;;  %1739 = vmatprep.subr.msk.mxu0 %vm2606_vm0, %v2326_v6  ;;  %1747 = vmatprep.subr.msk.mxu1 %vm2606_vm0, %v2334_v10  ;;  %v2377_v26 = vld [vmem:[%s2310_s7] sm:$0xff]  ;;  %s1542_s11 = sshll.u32 %s242_s18, 4  ;;  %s2546_s11 = int_to_ptr.vmem [resolvable:$true] %s1542_s11 }
  0x74   : > { %v2320_v1 = vshrl.u32 %v255_v0, 7  ;;  %1740 = vmatpush3.xpose.msk.msra.mxu0 %vm2606_vm0, %v2326_v6  ;;  %1748 = vmatpush3.xpose.msk.msra.mxu1 %vm2606_vm0, %v2334_v10  ;;  %v2380_v27 = vld [vmem:[%s2310_s7 + $0x8] sm:$0xff]  ;;  %vm620_vm1 = vcmp.eq.s32.totalorder %v2377_v26, 1  ;;  %vm626_vm2 = vcmp.eq.s32.totalorder %v2377_v26, 2  ;;  %v2386_v30 = vld [vmem:[%s2310_s7 + $0x10] sm:$0xff]  ;;  %vm632_vm4 = vcmp.eq.s32.totalorder %v2377_v26, 3 }
  0x75   : > { %1755 = vmatprep.subr.msk.mxu0 %vm2606_vm0, %v2336_v11  ;;  %vm621_vm3 = vcmp.eq.s32.totalorder %v2380_v27, 1  ;;  %vm638_vm5 = vcmp.eq.s32.totalorder %v2377_v26, 4  ;;  %vm627_vm11 = vcmp.eq.s32.totalorder %v2380_v27, 2  ;;  %vm633_vm12 = vcmp.eq.s32.totalorder %v2380_v27, 3  ;;  %s1696_s23 = smul.u32 384, %s2131_s16  ;;  %s1529_s16 = scalar_lea.sflag [#allocation4], %s2297_s26 }
  0x76   : > { %v257_v2 = vsub.s32 0, %v2320_v1  ;;  %v264_v3 = vsub.s32 1, %v2320_v1  ;;  %v271_v4 = vsub.s32 2, %v2320_v1  ;;  %v278_v5 = vsub.s32 3, %v2320_v1  ;;  %s2002_s9 = scalar_lea.vmem %s2546_s11, 384  ;;  %s2087_s29 = smov [#allocation8]  }
  0x77   : > { %vm622_vm13 = vcmp.eq.s32.totalorder %v2386_v30, 1  ;;  %s2554_s5 = scalar_lea.hbm %s2602_s3, %s1696_s23  ;;  %p2003_p3 = scmp.ne.s32.totalorder %s2546_s11, %s2002_s9 }
  0x78   : > { %v258_v8 = vrot.slane %v252_v7, %v257_v2  ;;  %v265_v9 = vrot.slane %v252_v7, %v264_v3  ;;  %v272_v12 = vrot.slane %v252_v7, %v271_v4  ;;  %v279_v13 = vrot.slane %v252_v7, %v278_v5  ;;  %s2006_s8 = sshll.u32 %s2087_s29, 4  ;;  %s2007_s8 = int_to_ptr.vmem [resolvable:$false] %s2006_s8 }
  0x79   : > { %p2004_p7 = pnand %p2003_p3, %p2201_p12  ;;  %s2008_s10 = scalar_lea.vmem %s2007_s8, 768 }
  0x7a   : > { %v259_v14 = vmul.f32 %v258_v8, %v2326_v6  ;;  %v266_v15 = vmul.f32 %v265_v9, %v2326_v6  ;;  %v260_v16 = vmul.f32 %v258_v8, %v2334_v10  ;;  %v267_v17 = vmul.f32 %v265_v9, %v2334_v10  ;;  %p2009_p1 = scmp.lt.s32.totalorder %s2546_s11, %s2007_s8  ;;  %p2010_p5 = scmp.lt.s32.totalorder %s2008_s10, %s2002_s9 }
  0x7b   : > { %v273_v18 = vmul.f32 %v272_v12, %v2326_v6  ;;  %v274_v19 = vmul.f32 %v272_v12, %v2334_v10  ;;  %v280_v20 = vmul.f32 %v279_v13, %v2326_v6  ;;  %v281_v21 = vmul.f32 %v279_v13, %v2334_v10  ;;  %p2005_p9 = pneg %p2004_p7 }
  0x7c   : > { %1741 = vmatprep.mubr.msk.f32.mxu0 %vm2606_vm0, %v259_v14  ;;  %1749 = vmatprep.mubr.msk.f32.mxu1 %vm2606_vm0, %v260_v16  ;;  %v261_v22 = vmul.f32 %v258_v8, %v2336_v11  ;;  %v268_v23 = vmul.f32 %v265_v9, %v2336_v11  ;;  %v275_v24 = vmul.f32 %v272_v12, %v2336_v11  ;;  %p2011_p2 = por %p2010_p5, %p2009_p1 }
  0x7d   : > { %1742 = vmatmul.mubr.msk.f32.vlgmr.msra.gmra.mrb[0].mxu0 %vm2606_vm0, %v266_v15  ;;  %1750 = vmatmul.mubr.msk.f32.vlgmr.msra.gmra.mrb[0].mxu1 %vm2606_vm0, %v267_v17  ;;  %v282_v25 = vmul.f32 %v279_v13, %v2336_v11 }
  0x7e   : > { %1744 = vmatprep.mubr.msk.f32.mxu0 %vm2606_vm0, %v273_v18  ;;  %1756 = vmatpush3.xpose.msk.msra.mxu0 %vm2606_vm0, %v2336_v11  ;;  %p2012_p6 = pnand %p2011_p2, %p2005_p9 }
  0x7f   : > { %1752 = vmatprep.mubr.msk.f32.mxu1 %vm2606_vm0, %v274_v19 }
  0x81   : > { %1745 = vmatmul.mubr.msk.f32.gmra.mrb[2].mxu0 %vm2606_vm0, %v280_v20  ;;  %1753 = vmatmul.mubr.msk.f32.gmra.mrb[2].mxu1 %vm2606_vm0, %v281_v21 }
  0x82   : > { %1757 = vmatprep.mubr.msk.f32.mxu0 %vm2606_vm0, %v261_v22 }
  0x85   : > { %1758 = vmatmul.mubr.msk.f32.vlgmr.msra.gmra.mrb[4].mxu0 %vm2606_vm0, %v268_v23 }
  0x86   : > { %1760 = vmatprep.mubr.msk.f32.mxu0 %vm2606_vm0, %v275_v24 }
  0x89   : > { %1761 = vmatmul.mubr.msk.f32.gmra.mrb[6].mxu0 %vm2606_vm0, %v282_v25 }
 0x150   : > { %v1743_v28 = vpop.f32.mrb[0].mxu0  ;;  %v1751_v29 = vpop.f32.mrb[0].mxu1 }
 0x151   : > { %vm585_vm6 = vcmp.gt.f32.partialorder %v1743_v28, 0.0  ;;  %v597_v31 = vmul.f32 0.2, %v1743_v28  ;;  %v365_v32 = vpop.f32.mrb[1].mxu0  ;;  %vm589_vm7 = vcmp.gt.f32.partialorder %v1751_v29, 0.0  ;;  %v465_v33 = vpop.f32.mrb[1].mxu1 }
 0x152   : > { %vm584_vm8 = vcmp.gt.f32.partialorder %v365_v32, 0.0  ;;  %v596_v34 = vmul.f32 0.2, %v365_v32  ;;  %v601_v35 = vmul.f32 0.2, %v1751_v29  ;;  %vm588_vm9 = vcmp.gt.f32.partialorder %v465_v33, 0.0 }
 0x153   : > { %v600_v36 = vmul.f32 0.2, %v465_v33  ;;  %v609_v37 = vsel %vm585_vm6, %v1743_v28, %v597_v31  ;;  %vm2610_vm6 = vcmp.eq.s32.totalorder %v2380_v27, 4 }
 0x154   : > { %v608_v38 = vsel %vm584_vm8, %v365_v32, %v596_v34  ;;  %v1746_v39 = vpop.f32.mrb[2].mxu0  ;;  %v613_v40 = vsel %vm589_vm7, %v1751_v29, %v601_v35  ;;  %v1754_v41 = vpop.f32.mrb[2].mxu1 }
 0x155   : > { %v623_v42 = vsel %vm620_vm1, %v608_v38, -9e+15  ;;  %vm587_vm14 = vcmp.gt.f32.partialorder %v1746_v39, 0.0  ;;  %v599_v43 = vmul.f32 0.2, %v1746_v39  ;;  %v375_v44 = vpop.f32.mrb[3].mxu0  ;;  %v612_v45 = vsel %vm588_vm9, %v465_v33, %v600_v36 }
 0x156   : > { %vm586_vm15 = vcmp.gt.f32.partialorder %v375_v44, 0.0  ;;  %v598_v46 = vmul.f32 0.2, %v375_v44  ;;  %v624_v47 = vsel %vm621_vm3, %v612_v45, -9e+15  ;;  %vm591_vm0 = vcmp.gt.f32.partialorder %v1754_v41, 0.0 }
 0x157   : > { %v603_v48 = vmul.f32 0.2, %v1754_v41  ;;  %v475_v49 = vpop.f32.mrb[3].mxu1  ;;  %v629_v50 = vsel %vm626_vm2, %v609_v37, %v623_v42  ;;  %v630_v51 = vsel %vm627_vm11, %v613_v40, %v624_v47  ;;  %v611_v55 = vsel %vm587_vm14, %v1746_v39, %v599_v43 }
 0x158   : > { %v610_v52 = vsel %vm586_vm15, %v375_v44, %v598_v46  ;;  %v1759_v53 = vpop.f32.mrb[4].mxu0  ;;  %vm590_vm7 = vcmp.gt.f32.partialorder %v475_v49, 0.0  ;;  %v602_v54 = vmul.f32 0.2, %v475_v49  ;;  %vm2609_vm14 = vcmp.eq.s32.totalorder %v2386_v30, 2 }
 0x159   : > { %v615_v56 = vsel %vm591_vm0, %v1754_v41, %v603_v48  ;;  %vm593_vm8 = vcmp.gt.f32.partialorder %v1759_v53, 0.0  ;;  %v605_v57 = vmul.f32 0.2, %v1759_v53  ;;  %v565_v58 = vpop.f32.mrb[5].mxu0  ;;  %v635_v59 = vsel %vm632_vm4, %v610_v52, %v629_v50  ;;  %v254_v52 = vld [vmem:[#allocation7 + $0x4] sm:$0xf] }
 0x15a   : > { %v614_v60 = vsel %vm590_vm7, %v475_v49, %v602_v54  ;;  %vm592_vm9 = vcmp.gt.f32.partialorder %v565_v58, 0.0  ;;  %v604_v61 = vmul.f32 0.2, %v565_v58  ;;  %v641_v62 = vsel %vm638_vm5, %v611_v55, %v635_v59 }
 0x15b   : > { %v645_v63 = vsel %vm644_vm10, %v641_v62, -inf  ;;  %v636_v0 = vsel %vm633_vm12, %v614_v60, %v630_v51  ;;  %v617_v12 = vsel %vm593_vm8, %v1759_v53, %v605_v57  ;;  %vm2608_vm0 = vcmp.eq.s32.totalorder %v2386_v30, 3 }
 0x15c   : > { %v616_v7 = vsel %vm592_vm9, %v565_v58, %v604_v61  ;;  %646 = vmax.xlane.f32.xlu0 %v645_v63  ;;  %v1762_v8 = vpop.f32.mrb[6].mxu0  ;;  %v642_v9 = vsel %vm2610_vm6, %v615_v56, %v636_v0  ;;  %vm2607_vm9 = vcmp.eq.s32.totalorder %v2386_v30, 4  ;;  %v2085_v42 = vmov 0.0  }
 0x15d   : > { %v625_v13 = vsel %vm622_vm13, %v616_v7, -9e+15  ;;  %v607_v14 = vmul.f32 0.2, %v1762_v8  ;;  %v575_v15 = vpop.f32.mrb[7].mxu0  ;;  %vm595_vm15 = vcmp.gt.f32.partialorder %v1762_v8, 0.0  ;;  %1763 = vmatprep.subr.mxu1 %v2085_v42  ;;  %1773 = vmatprep.subr.mxu0 %v2085_v42  ;;  %v900_v53 = vrot.slane %v254_v52, %v257_v2 }
 0x15e   : > { %vm594_vm7 = vcmp.gt.f32.partialorder %v575_v15, 0.0  ;;  %v606_v16 = vmul.f32 0.2, %v575_v15  ;;  %v631_v17 = vsel %vm2609_vm14, %v617_v12, %v625_v13  ;;  %v648_v18 = vsel %vm644_vm10, %v642_v9, -inf  ;;  %1764 = vmatpush3.msra.mxu1 %v2326_v6  ;;  %1774 = vmatpush3.msra.mxu0 %v2336_v11 }
 0x15f   : > { %v619_v20 = vsel %vm595_vm15, %v1762_v8, %v607_v14  ;;  %vm2086_vm8 = vmmov 0   ;;  %1768 = vmatprep.subr.mxu1 %v2085_v42  ;;  %v907_v55 = vrot.slane %v254_v52, %v264_v3  ;;  %v914_v58 = vrot.slane %v254_v52, %v271_v4 }
 0x160   : > { %v618_v19 = vsel %vm594_vm7, %v575_v15, %v606_v16  ;;  %649 = vmax.xlane.f32.xlu0 %v648_v18  ;;  %1765 = vmatprep.mubr.msk.f32.mxu1 %vm2086_vm8, %v2085_v42  ;;  %vm2622_vm15 = vcmask 261120   ;;  %v921_v4 = vrot.slane %v254_v52, %v278_v5 }
 0x161   : > { %v637_v21 = vsel %vm2608_vm0, %v618_v19, %v631_v17  ;;  %1775 = vmatprep.mubr.msk.f32.mxu0 %vm2086_vm8, %v2085_v42  ;;  %vm2623_vm7 = vmmov %vm2622_vm15 }
 0x162   : > { %v643_v22 = vsel %vm2607_vm9, %v619_v20, %v637_v21  ;;  %vm2624_vm9 = vmmov %vm2623_vm7 }
 0x163   : > { %v651_v23 = vsel %vm644_vm10, %v643_v22, -inf  ;;  %vm2626_vm0 = vmmov %vm2623_vm7 }
 0x164   : > { %652 = vmax.xlane.f32.xlu1 %v651_v23  ;;  %vm2628_vm14 = vmmov %vm2626_vm0 }
 0x165   : > { %vm2634_vm6 = vmmov %vm2626_vm0 }
 0x1e9   : > { %v647_v24 = vpop.xlane.xlu0 %646 }
 0x1ea   : > { %v654_v25 = vsub.f32 %v641_v62, %v647_v24 }
 0x1ec   : > { %v657_v28 = vmul.f32 1.442695, %v654_v25 }
 0x1ed   : > { %v650_v29 = vpop.xlane.xlu0 %649 }
 0x1ee   : > { %1890 = vpow2.f32 %v657_v28  ;;  %v655_v31 = vsub.f32 %v642_v9, %v650_v29 }
 0x1f0   : > { %v659_v32 = vmul.f32 1.442695, %v655_v31 }
 0x1f1   : > { %v653_v33 = vpop.xlane.xlu1 %652 }
 0x1f2   : > { %1892 = vpow2.f32 %v659_v32  ;;  %v656_v34 = vsub.f32 %v643_v22, %v653_v33 }
 0x1f4   : > { %v661_v35 = vmul.f32 1.442695, %v656_v34 }
 0x1f6   : > { %1894 = vpow2.f32 %v661_v35 }
 0x1f8   : > { %v1891_v36 = vpop.eup %1890 }
 0x1f9   : > { %v663_v37 = vsel %vm644_vm10, %v1891_v36, 0.0 }
 0x1fa   : > { %664 = vadd.xlane.f32.xlu1 %v663_v37 }
 0x1fc   : > { %v1893_v38 = vpop.eup %1892 }
 0x1fd   : > { %v666_v39 = vsel %vm644_vm10, %v1893_v38, 0.0 }
 0x1fe   : > { %667 = vadd.xlane.f32.xlu0 %v666_v39 }
 0x200   : > { %v1895_v40 = vpop.eup %1894 }
 0x201   : > { %v669_v41 = vsel %vm644_vm10, %v1895_v40, 0.0 }
 0x202   : > { %670 = vadd.xlane.f32.xlu1 %v669_v41 }
 0x287   : > { %v665_v43 = vpop.xlane.xlu1 %664 }
 0x288   : > { %1896 = vrcp.f32 %v665_v43 }
 0x28b   : > { %v668_v44 = vpop.xlane.xlu0 %667 }
 0x28c   : > { %1898 = vrcp.f32 %v668_v44 }
 0x28f   : > { %v671_v45 = vpop.xlane.xlu1 %670 }
 0x290   : > { %1900 = vrcp.f32 %v671_v45 }
 0x292   : > { %v1897_v46 = vpop.eup %1896 }
 0x293   : > { %v675_v47 = vmul.f32 %v1897_v46, %v1891_v36 }
 0x295   : > { %1766 = vmatmul.mubr.msk.f32.vlgmr.msra.gmra.mrb[4].mxu1 %vm644_vm10, %v675_v47 }
 0x296   : > { %v1899_v48 = vpop.eup %1898  ;;  %1769 = vmatpush3.msra.mxu1 %v2334_v10  ;;  %1770 = vmatprep.mubr.msk.f32.mxu1 %vm2086_vm8, %v2085_v42 }
 0x297   : > { %v676_v49 = vmul.f32 %v1899_v48, %v1893_v38 }
 0x299   : > { %1771 = vmatmul.mubr.msk.f32.vlgmr.msra.gmra.mrb[6].mxu1 %vm644_vm10, %v676_v49 }
 0x29a   : > { %v1901_v50 = vpop.eup %1900 }
 0x29b   : > { %v677_v51 = vmul.f32 %v1901_v50, %v1895_v40 }
 0x29d   : > { %1776 = vmatmul.mubr.msk.f32.vlgmr.msra.gmra.mrb[8].mxu0 %vm644_vm10, %v677_v51 }
 0x368   : > { %v747_v54 = vpop.f32.mrb[4].mxu1 }
 0x369   : > { %v2448_v56 = vadd.f32 %v747_v54, %v2326_v6  ;;  %v1767_v57 = vpop.f32.mrb[5].mxu1 }
 0x36b   : > { %1778 = vmatprep.subr.msk.mxu1 %vm2622_vm15, %v2448_v56  ;;  %v901_v59 = vmul.f32 %v900_v53, %v2448_v56  ;;  %v908_v6 = vmul.f32 %v907_v55, %v2448_v56  ;;  %v915_v61 = vmul.f32 %v914_v58, %v2448_v56  ;;  %vm2625_vm15 = vmmov %vm2623_vm7  ;;  %v922_v5 = vmul.f32 %v921_v4, %v2448_v56 }
 0x36c   : > { %v820_v60 = vpop.f32.mrb[6].mxu1  ;;  %1779 = vmatpush3.xpose.msk.msra.mxu1 %vm2623_vm7, %v2448_v56  ;;  %vm2627_vm7 = vmmov %vm2626_vm0 }
 0x36d   : > { %v2458_v2 = vadd.f32 %v820_v60, %v2334_v10  ;;  %v1772_v3 = vpop.f32.mrb[7].mxu1  ;;  %1780 = vmatprep.mubr.msk.f32.mxu1 %vm2624_vm9, %v901_v59  ;;  %vm2629_vm9 = vmmov %vm2626_vm0 }
 0x36f   : > { %1781 = vmatmul.mubr.msk.f32.vlgmr.msra.gmra.mrb[8].mxu1 %vm2625_vm15, %v908_v6  ;;  %1786 = vmatprep.subr.msk.mxu0 %vm2626_vm0, %v2458_v2  ;;  %v902_v62 = vmul.f32 %v900_v53, %v2458_v2  ;;  %v909_v0 = vmul.f32 %v907_v55, %v2458_v2  ;;  %v916_v7 = vmul.f32 %v914_v58, %v2458_v2  ;;  %vm2630_vm15 = vmmov %vm2626_vm0 }
 0x370   : > { %v893_v63 = vpop.f32.mrb[8].mxu0  ;;  %1783 = vmatprep.mubr.msk.f32.mxu1 %vm2627_vm7, %v915_v61  ;;  %1787 = vmatpush3.xpose.msk.msra.mxu0 %vm2628_vm14, %v2458_v2  ;;  %vm2631_vm14 = vmmov %vm2626_vm0 }
 0x371   : > { %v2473_v10 = vadd.f32 %v893_v63, %v2336_v11  ;;  %v1777_v1 = vpop.f32.mrb[9].mxu0  ;;  %1788 = vmatprep.mubr.msk.f32.mxu0 %vm2629_vm9, %v902_v62  ;;  %1802 = vmatprep.subr.mxu0 %v2085_v42  ;;  %vm2632_vm7 = vmmov %vm2626_vm0  ;;  %v923_v11 = vmul.f32 %v921_v4, %v2458_v2 }
 0x372   : > { %vm2633_vm9 = vmmov %vm2626_vm0 }
 0x373   : > { %1784 = vmatmul.mubr.msk.f32.gmra.mrb[10].mxu1 %vm2626_vm0, %v922_v5  ;;  %1789 = vmatmul.mubr.msk.f32.vlgmr.msra.gmra.mrb[10].mxu0 %vm2630_vm15, %v909_v0  ;;  %v903_v8 = vmul.f32 %v900_v53, %v2473_v10  ;;  %v910_v9 = vmul.f32 %v907_v55, %v2473_v10  ;;  %v917_v12 = vmul.f32 %v914_v58, %v2473_v10  ;;  %vm2635_vm15 = vmmov %vm2626_vm0 }
 0x374   : > { %1794 = vmatprep.subr.msk.mxu1 %vm2631_vm14, %v2473_v10  ;;  %1791 = vmatprep.mubr.msk.f32.mxu0 %vm2632_vm7, %v916_v7  ;;  %vm2636_vm14 = vmmov %vm2626_vm0  ;;  %v924_v13 = vmul.f32 %v921_v4, %v2473_v10 }
 0x375   : > { %1795 = vmatpush3.xpose.msk.msra.mxu1 %vm2633_vm9, %v2473_v10  ;;  %1803 = vmatpush3.msra.mxu0 %v2448_v56 }
 0x376   : > { %1796 = vmatprep.mubr.msk.f32.mxu1 %vm2634_vm6, %v903_v8  ;;  %1812 = vmatprep.subr.mxu1 %v2085_v42  ;;  %vm2637_vm6 = vmmov %vm2626_vm0 }
 0x377   : > { %1792 = vmatmul.mubr.msk.f32.gmra.mrb[12].mxu0 %vm2626_vm0, %v923_v11  ;;  %1807 = vmatprep.subr.mxu0 %v2085_v42 }
 0x378   : > { %1797 = vmatmul.mubr.msk.f32.vlgmr.msra.gmra.mrb[12].mxu1 %vm2635_vm15, %v910_v9  ;;  %1804 = vmatprep.mubr.msk.f32.mxu0 %vm2086_vm8, %v2085_v42 }
 0x379   : > { %1799 = vmatprep.mubr.msk.f32.mxu1 %vm2636_vm14, %v917_v12  ;;  %1813 = vmatpush3.msra.mxu1 %v2473_v10 }
 0x37c   : > { %1800 = vmatmul.mubr.msk.f32.gmra.mrb[14].mxu1 %vm2637_vm6, %v924_v13 }
 0x37d   : > { %1814 = vmatprep.mubr.msk.f32.mxu1 %vm2086_vm8, %v2085_v42 }
 0x442   : > { %v1782_v14 = vpop.f32.mrb[8].mxu1 }
 0x443   : > { %v1238_v15 = vmul.f32 0.2, %v1782_v14  ;;  %v1006_v16 = vpop.f32.mrb[9].mxu1  ;;  %vm1226_vm7 = vcmp.gt.f32.partialorder %v1782_v14, 0.0 }
 0x444   : > { %vm1225_vm9 = vcmp.gt.f32.partialorder %v1006_v16, 0.0  ;;  %v1237_v17 = vmul.f32 0.2, %v1006_v16 }
 0x445   : > { %v1250_v21 = vsel %vm1226_vm7, %v1782_v14, %v1238_v15 }
 0x446   : > { %v1249_v18 = vsel %vm1225_vm9, %v1006_v16, %v1237_v17  ;;  %v1785_v19 = vpop.f32.mrb[10].mxu1  ;;  %v1790_v20 = vpop.f32.mrb[10].mxu0 }
 0x447   : > { %v1261_v22 = vsel %vm620_vm1, %v1249_v18, -9e+15  ;;  %v1016_v23 = vpop.f32.mrb[11].mxu1  ;;  %v1106_v24 = vpop.f32.mrb[11].mxu0  ;;  %v1242_v28 = vmul.f32 0.2, %v1790_v20 }
 0x448   : > { %v1264_v25 = vsel %vm626_vm2, %v1250_v21, %v1261_v22  ;;  %vm1227_vm0 = vcmp.gt.f32.partialorder %v1016_v23, 0.0  ;;  %v1239_v29 = vmul.f32 0.2, %v1016_v23  ;;  %vm1229_vm15 = vcmp.gt.f32.partialorder %v1106_v24, 0.0 }
 0x449   : > { %v1240_v31 = vmul.f32 0.2, %v1785_v19  ;;  %vm1230_vm14 = vcmp.gt.f32.partialorder %v1790_v20, 0.0  ;;  %v1241_v32 = vmul.f32 0.2, %v1106_v24  ;;  %vm1228_vm6 = vcmp.gt.f32.partialorder %v1785_v19, 0.0 }
 0x44a   : > { %v1793_v33 = vpop.f32.mrb[12].mxu0  ;;  %v1251_v34 = vsel %vm1227_vm0, %v1016_v23, %v1239_v29  ;;  %v1254_v41 = vsel %vm1230_vm14, %v1790_v20, %v1242_v28  ;;  %vm2640_vm0 = vcmp.eq.s32.totalorder %v2386_v30, 3 }
 0x44b   : > { %vm1232_vm9 = vcmp.gt.f32.partialorder %v1793_v33, 0.0  ;;  %v1244_v35 = vmul.f32 0.2, %v1793_v33  ;;  %v1798_v36 = vpop.f32.mrb[12].mxu1  ;;  %v1116_v37 = vpop.f32.mrb[13].mxu0  ;;  %v1253_v38 = vsel %vm1229_vm15, %v1106_v24, %v1241_v32  ;;  %v1252_v45 = vsel %vm1228_vm6, %v1785_v19, %v1240_v31 }
 0x44c   : > { %vm1234_vm1 = vcmp.gt.f32.partialorder %v1798_v36, 0.0  ;;  %v1246_v39 = vmul.f32 0.2, %v1798_v36  ;;  %vm1231_vm7 = vcmp.gt.f32.partialorder %v1116_v37, 0.0  ;;  %v1206_v40 = vpop.f32.mrb[13].mxu1  ;;  %v1267_v47 = vsel %vm632_vm4, %v1251_v34, %v1264_v25 }
 0x44d   : > { %v1262_v43 = vsel %vm621_vm3, %v1253_v38, -9e+15  ;;  %v1243_v44 = vmul.f32 0.2, %v1116_v37  ;;  %vm1233_vm2 = vcmp.gt.f32.partialorder %v1206_v40, 0.0  ;;  %v1256_v49 = vsel %vm1232_vm9, %v1793_v33, %v1244_v35 }
 0x44e   : > { %v1245_v46 = vmul.f32 0.2, %v1206_v40  ;;  %v1265_v48 = vsel %vm627_vm11, %v1254_v41, %v1262_v43  ;;  %v1258_v50 = vsel %vm1234_vm1, %v1798_v36, %v1246_v39  ;;  %v1270_v52 = vsel %vm638_vm5, %v1252_v45, %v1267_v47 }
 0x44f   : > { %v1255_v51 = vsel %vm1231_vm7, %v1116_v37, %v1243_v44  ;;  %v1801_v53 = vpop.f32.mrb[14].mxu1  ;;  %v1273_v55 = vsel %vm644_vm10, %v1270_v52, -inf  ;;  %vm2638_vm11 = vcmp.eq.s32.totalorder %v2380_v27, 4  ;;  %vm2639_vm5 = vcmp.eq.s32.totalorder %v2386_v30, 2 }
 0x450   : > { %v1257_v54 = vsel %vm1233_vm2, %v1206_v40, %v1245_v46  ;;  %vm1236_vm3 = vcmp.gt.f32.partialorder %v1801_v53, 0.0  ;;  %v1248_v57 = vmul.f32 0.2, %v1801_v53  ;;  %v1216_v58 = vpop.f32.mrb[15].mxu1  ;;  %1274 = vmax.xlane.f32.xlu0 %v1273_v55  ;;  %v1268_v3 = vsel %vm633_vm12, %v1255_v51, %v1265_v48 }
 0x451   : > { %v1263_v59 = vsel %vm622_vm13, %v1257_v54, -9e+15  ;;  %vm1235_vm4 = vcmp.gt.f32.partialorder %v1216_v58, 0.0  ;;  %v1247_v60 = vmul.f32 0.2, %v1216_v58  ;;  %v1271_v26 = vsel %vm2638_vm11, %v1256_v49, %v1268_v3 }
 0x452   : > { %v1266_v6 = vsel %vm2639_vm5, %v1258_v50, %v1263_v59  ;;  %v1276_v61 = vsel %vm644_vm10, %v1271_v26, -inf  ;;  %v1260_v62 = vsel %vm1236_vm3, %v1801_v53, %v1248_v57  ;;  %vm2641_vm13 = vcmp.eq.s32.totalorder %v2386_v30, 4 }
 0x453   : > { %v1259_v4 = vsel %vm1235_vm4, %v1216_v58, %v1247_v60  ;;  %1277 = vmax.xlane.f32.xlu1 %v1276_v61  ;;  %vm2642_vm12 = vcmask 261120  }
 0x454   : > { %v1269_v63 = vsel %vm2640_vm0, %v1259_v4, %v1266_v6 }
 0x455   : > { %v1272_v1 = vsel %vm2641_vm13, %v1260_v62, %v1269_v63 }
 0x456   : > { %v1279_v5 = vsel %vm644_vm10, %v1272_v1, -inf }
 0x457   : > { %1280 = vmax.xlane.f32.xlu0 %v1279_v5 }
 0x4dd   : > { %v1275_v0 = vpop.xlane.xlu0 %1274 }
 0x4de   : > { %v1282_v27 = vsub.f32 %v1270_v52, %v1275_v0 }
 0x4e0   : > { %v1285_v7 = vmul.f32 1.442695, %v1282_v27  ;;  %v1278_v8 = vpop.xlane.xlu1 %1277 }
 0x4e1   : > { %v1283_v11 = vsub.f32 %v1271_v26, %v1278_v8 }
 0x4e2   : > { %1902 = vpow2.f32 %v1285_v7 }
 0x4e3   : > { %v1287_v9 = vmul.f32 1.442695, %v1283_v11 }
 0x4e4   : > { %v1281_v12 = vpop.xlane.xlu0 %1280 }
 0x4e5   : > { %v1284_v13 = vsub.f32 %v1272_v1, %v1281_v12  ;;  %1904 = vpow2.f32 %v1287_v9 }
 0x4e7   : > { %v1289_v14 = vmul.f32 1.442695, %v1284_v13 }
 0x4e9   : > { %1906 = vpow2.f32 %v1289_v14 }
 0x4ec   : > { %v1903_v15 = vpop.eup %1902 }
 0x4ed   : > { %v1291_v16 = vsel %vm644_vm10, %v1903_v15, 0.0 }
 0x4ee   : > { %1292 = vadd.xlane.f32.xlu1 %v1291_v16 }
 0x4ef   : > { %v1905_v30 = vpop.eup %1904 }
 0x4f0   : > { %v1294_v17 = vsel %vm644_vm10, %v1905_v30, 0.0 }
 0x4f1   : > { %1295 = vadd.xlane.f32.xlu0 %v1294_v17 }
 0x4f3   : > { %v1907_v18 = vpop.eup %1906 }
 0x4f4   : > { %v1297_v19 = vsel %vm644_vm10, %v1907_v18, 0.0 }
 0x4f5   : > { %1298 = vadd.xlane.f32.xlu1 %v1297_v19 }
 0x57b   : > { %v1293_v20 = vpop.xlane.xlu1 %1292 }
 0x57c   : > { %1908 = vrcp.f32 %v1293_v20 }
 0x57e   : > { %v1296_v21 = vpop.xlane.xlu0 %1295 }
 0x57f   : > { %1910 = vrcp.f32 %v1296_v21 }
 0x582   : > { %v1299_v22 = vpop.xlane.xlu1 %1298 }
 0x583   : > { %1912 = vrcp.f32 %v1299_v22 }
 0x586   : > { %v1909_v23 = vpop.eup %1908 }
 0x587   : > { %v1303_v24 = vmul.f32 %v1909_v23, %v1903_v15 }
 0x589   : > { %v1911_v25 = vpop.eup %1910  ;;  %1805 = vmatmul.mubr.msk.f32.vlgmr.msra.gmra.mrb[14].mxu0 %vm644_vm10, %v1303_v24 }
 0x58a   : > { %v1304_v28 = vmul.f32 %v1911_v25, %v1905_v30  ;;  %1808 = vmatpush3.msra.mxu0 %v2458_v2  ;;  %1809 = vmatprep.mubr.msk.f32.mxu0 %vm2086_vm8, %v2085_v42 }
 0x58d   : > { %v1913_v29 = vpop.eup %1912  ;;  %1810 = vmatmul.mubr.msk.f32.vlgmr.msra.gmra.mrb[16].mxu0 %vm644_vm10, %v1304_v28 }
 0x58e   : > { %v1305_v31 = vmul.f32 %v1913_v29, %v1907_v18 }
 0x590   : > { %1815 = vmatmul.mubr.msk.f32.vlgmr.msra.gmra.mrb[16].mxu1 %vm644_vm10, %v1305_v31  ;;  %vm2643_vm10 = vmmov %vm2642_vm12 }
 0x591   : > { %vm2644_vm8 = vmmov %vm2643_vm10 }
 0x65c   : > { %v1375_v32 = vpop.f32.mrb[14].mxu0 }
 0x65d   : > { %v1376_v33 = vadd.f32 %v1375_v32, %v2448_v56  ;;  %v1806_v34 = vpop.f32.mrb[15].mxu0 }
 0x65f   : > { %1525 = vst.msk [vmem:[%s242_s18] sm:$0xff] %vm2642_vm12, %v1376_v33 }
 0x660   : > { %v1448_v35 = vpop.f32.mrb[16].mxu0 }
 0x661   : > { %v1449_v42 = vadd.f32 %v1448_v35, %v2458_v2  ;;  %v1811_v36 = vpop.f32.mrb[17].mxu0 }
 0x663   : > { %v1521_v37 = vpop.f32.mrb[16].mxu1  ;;  %1526 = vst.msk [vmem:[%s242_s18 + $0x8] sm:$0xff] %vm2643_vm10, %v1449_v42 }
 0x664   : > { %v1522_v56 = vadd.f32 %v1521_v37, %v2473_v10  ;;  %v1816_v38 = vpop.f32.mrb[17].mxu1 }
 0x666   : > { %1527 = vst.msk [vmem:[%s242_s18 + $0x10] sm:$0xff] %vm2644_vm8, %v1522_v56 }
 0x667   : > { %2015 = shalt.err (!%p2012_p6)
}
 0x668   : > { %s2016_s27 = scalar_lea.hbm %s2554_s5, 384  ;;  %s2020_s4 = scalar_lea.hbm %s2602_s3, 768 }
 0x669   : > { %p2017_p8 = scmp.ne.s32.totalorder %s2554_s5, %s2016_s27  ;;  %p2021_p4 = scmp.lt.u32.totalorder %s2554_s5, %s2602_s3 }
 0x66a   : > { %p2022_p11 = scmp.lt.u32.totalorder %s2020_s4, %s2016_s27  ;;  %p2024_p3 = scmp.lt.u32.totalorder %s2016_s27, %s2554_s5 }
 0x66b   : > { %p2018_p10 = pnand %p2017_p8, %p2201_p12 }
 0x66c   : > { %p2023_p13 = por %p2022_p11, %p2021_p4 }
 0x66d   : > { %p2019_p0 = pneg %p2018_p10 }
 0x66e   : > { %p2025_p7 = por %p2024_p3, %p2023_p13 }
 0x670   : > { %p2026_p9 = pnand %p2025_p7, %p2019_p0 }
 0x672   : > { %2029 = shalt.err (!%p2026_p9)
}
 0x673   : > { %s2088_s7 = smov 128   ;;  %s2089_s18 = smov 8  }
 0x674   : > { %1828 = dma.vmem_to_hbm [thread:$0]  (%p2201_p12), %s2546_s11, 384, %s2554_s5, %s1529_s16, %s2088_s7, %s2088_s7, %s2089_s18  }
 0x675 PF: > { %s1557_s23 = sand.u32 1, %s2064_s12   ;;  %p2645_p1 = scmp.ne.s32.totalorder %s2612_s19, 0 }
 0x676   : > { %p2646_p5 = scmp.ge.s32.totalorder %s2076_s15, 2  ;;  %s1558_s30 = scalar_lea.sflag [#allocation4], %s1557_s23 }
 0x678   : > { %p1842_p2 = pnand %p2646_p5, %p2645_p1 }
 0x67a   : > { %2059 = dma.done.wait (!%p1842_p2), %s1558_s30, 384  }
 0x67b   : > { %2061 = vsyncadd (!%p1842_p2), %s1558_s30, 4294966912  ;;  %p19_p6 = scmp.ge.s32.totalorder %s2166_s24, 4   ;;  %s2647_s12 = smov %s2068_s13 }
 0x67c   : > { %s2648_s13 = smov %s2072_s14  ;;  %s2649_s14 = smov %s2197_s17 }
 0x67d   : > { %s2650_s15 = smov %s2166_s24  ;;  %21 = sbr.rel (!%p19_p6) target bundleno = 7 (0x7), region = 95 }
 0x684   :  { %1563 = vsyncpa [#allocation3], 1 }
 0x685   :  { %1565 = vsyncpa [#allocation3 + $0x1], 1 }
 0x686   :  { %1566 = vsyncpa [#allocation6], 1 }
 0x687   :  { %1568 = vsyncpa [#allocation6 + $0x1], 1 }
 0x688   :  { %1569 = vsyncpa [#allocation4], 1 }
 0x689   :  { %1571 = vsyncpa [#allocation4 + $0x1], 1 }

</bundles_post_ra>
